<compile_context>
chip_gen: v6e
topology: v6e:2x2x1
jax: 0.10.0
libtpu: 0.0.40
codegen_flags: <defaults>
</compile_context>

<pallas_src>
import jax
import jax.numpy as jnp
from jax import lax
from jax.experimental import pallas as pl
from jax.experimental.pallas import tpu as pltpu

HIDDEN = 64
TILE_B_MAX = 32768                        # upper bound on the batch tile
VMEM_LIVE_BUDGET = 40 * 1024 * 1024       # target for live double-buffered tiles
VMEM_LIMIT_BYTES = 48 * 1024 * 1024       # fits v7x's 64 MiB physical VMEM per TC


def _round_up(n, m):
    return ((n + m - 1) // m) * m


def _pick_tile_b(B, D, x_itemsize):
    """Largest batch tile whose double-buffered VMEM footprint fits the budget.

    Accounts for lane padding of the (tile_b, D) x tile (minor dim padded to 128
    in VMEM) and the f32 (64, tile_b) intermediates.  Keeps >=2 grid steps when B
    is large so the 'parallel' batch axis can use both TensorCores on v7x.
    """
    lanes = _round_up(max(D, 1), 128)                 # VMEM lane padding of x tile
    per_row = (2 * lanes * x_itemsize                 # double-buffered x tile
               + 2 * HIDDEN * 4                       # f32 (64, tb) intermediates
               + 2 * 4)                               # double-buffered (1, tb) out
    cap = min(TILE_B_MAX, max(512, (VMEM_LIVE_BUDGET // per_row) // 512 * 512))
    if B <= 512:
        return min(_round_up(B, 8), cap)              # exact single tile, no clamping
    tb = min(cap, _round_up(B, 512))
    if pl.cdiv(B, tb) < 2:
        tb = _round_up(pl.cdiv(B, 2), 512)            # >=2 steps -> both v7x TCs busy
    return tb


def _approximator_kernel(x_ref, w1t_ref, b1_ref, w2_ref, b2_ref, ot_ref):
    # x   : (TILE_B, D)  -- batch on sublanes, features on lanes (HBM-native layout)
    # w1t : (64, D), b1: (64, 1), w2: (64, 1), b2: (1, 1)
    # Hidden layer on the MXU as an NT matmul: h^T[u, b] = sum_d w1t[u, d] * x[b, d]
    ht = lax.dot_general(
        w1t_ref[...], x_ref[...],
        dimension_numbers=(((1,), (1,)), ((), ())),
        preferred_element_type=jnp.float32)                   # (64, TILE_B) f32 acc
    ht = jnp.maximum(ht + b1_ref[...], 0.0)                   # bias bcast + ReLU (VPU)
    # Output layer: VPU multiply + sublane reduce (avoids an N=1 MXU matmul).
    y = jnp.sum(ht * w2_ref[...], axis=0, keepdims=True) + b2_ref[...]   # (1, TILE_B)
    ot_ref[...] = jax.nn.sigmoid(y).astype(ot_ref.dtype)      # lane-dense store


def approximator_forward(x, w1, b1, w2, b2):
    """x: (B, D); w1: (D, 64); b1: (1, 64); w2: (64, 1); b2: (1, 1) -> (B, 1)."""
    B, D = x.shape
    compute_dtype = x.dtype                    # pass bf16 x for ~2x HBM bandwidth
    itemsize = jnp.dtype(compute_dtype).itemsize
    tb = _pick_tile_b(B, D, itemsize)
    grid = (pl.cdiv(B, tb),)
    Bp = tb * grid[0]                          # output padded to whole tiles (tiny)

    # Tiny parameter reshapes only -- the big activation tensor is never copied.
    w1t = jnp.asarray(w1, compute_dtype).T                      # (64, D)
    b1c = jnp.asarray(b1, jnp.float32).reshape(HIDDEN, 1)       # (64, 1)
    w2c = jnp.asarray(w2, jnp.float32).reshape(HIDDEN, 1)       # (64, 1)
    b2c = jnp.asarray(b2, jnp.float32).reshape(1, 1)            # (1, 1)

    cost = pl.CostEstimate(
        flops=int(2 * B * HIDDEN * (D + 1)),
        transcendentals=int(B),
        bytes_accessed=int(B * D * itemsize + B * 4
                           + (D * HIDDEN + 2 * HIDDEN + 1) * 4))

    ot = pl.pallas_call(
        _approximator_kernel,
        out_shape=jax.ShapeDtypeStruct((1, Bp), jnp.float32),
        grid=grid,
        in_specs=[
            pl.BlockSpec((tb, D), lambda i: (i, 0)),       # stream x; no transpose/pad
            pl.BlockSpec((HIDDEN, D), lambda i: (0, 0)),   # weights stay VMEM-resident
            pl.BlockSpec((HIDDEN, 1), lambda i: (0, 0)),
            pl.BlockSpec((HIDDEN, 1), lambda i: (0, 0)),
            pl.BlockSpec((1, 1), lambda i: (0, 0)),
        ],
        out_specs=pl.BlockSpec((1, tb), lambda i: (0, i)), # lane-dense output tile
        compiler_params=pltpu.CompilerParams(
            dimension_semantics=("parallel",),             # megacore sharding on v7x
            vmem_limit_bytes=VMEM_LIMIT_BYTES,
        ),
        cost_estimate=cost,
    )(x, w1t, b1c, w2c, b2c)
    return ot[:, :B].T                                     # back to (B, 1); B*4 bytes


def init_params(key, in_features, hidden=HIDDEN, out_features=1):
    """Deterministic init mirroring nn.Linear's U(-1/sqrt(fan_in), 1/sqrt(fan_in))."""
    k1, k2, k3, k4 = jax.random.split(key, 4)
    lim1 = 1.0 / jnp.sqrt(jnp.float32(in_features))
    lim2 = 1.0 / jnp.sqrt(jnp.float32(hidden))
    w1 = jax.random.uniform(k1, (in_features, hidden), jnp.float32, -lim1, lim1)
    b1 = jax.random.uniform(k2, (1, hidden), jnp.float32, -lim1, lim1)
    w2 = jax.random.uniform(k3, (hidden, out_features), jnp.float32, -lim2, lim2)
    b2 = jax.random.uniform(k4, (1, out_features), jnp.float32, -lim2, lim2)
    return w1, b1, w2, b2


if __name__ == "__main__":
    key = jax.random.PRNGKey(0)
    kx, kp = jax.random.split(key)

    # input_shape = (32,)  ->  Linear(32, 64) -> ReLU -> Linear(64, 1) -> Sigmoid
    in_features = 32
    batch = 8
    x = jax.random.normal(kx, (batch, in_features), jnp.float32)
    w1, b1, w2, b2 = init_params(kp, in_features)

    out = approximator_forward(x, w1, b1, w2, b2)
    out = jax.block_until_ready(out)

    # Pure-JAX reference check
    ref = jax.nn.sigmoid(jnp.maximum(x @ w1 + b1, 0.0) @ w2 + b2)
    assert out.shape == (batch, 1)
    assert jnp.allclose(out, ref, atol=1e-5, rtol=1e-5)

    print("KERNEL_OK")
</pallas_src>

<mosaic_0001>
module attributes {stable_mosaic.version = 11 : i64} {
  func.func @_approximator_kernel(%arg0: i32, %arg1: memref<8x32xf32, #tpu.memory_space<vmem>>, %arg2: memref<64x32xf32, #tpu.memory_space<vmem>>, %arg3: memref<64x1xf32, #tpu.memory_space<vmem>>, %arg4: memref<64x1xf32, #tpu.memory_space<vmem>>, %arg5: memref<1x1xf32, #tpu.memory_space<vmem>>, %arg6: memref<1x8xf32, #tpu.memory_space<vmem>>) attributes {dimension_semantics = [#tpu.dimension_semantics<parallel>], iteration_bounds = array<i64: 1>, scalar_prefetch = 0 : i64, scratch_operands = 0 : i64, tpu.core_type = #tpu.core_type<tc>, window_params = [{transform_indices = @transform_0, window_bounds = array<i64: 8, 32>}, {pipeline_mode = #tpu.pipeline_mode<synchronous>, transform_indices = @transform_1, window_bounds = array<i64: 64, 32>}, {pipeline_mode = #tpu.pipeline_mode<synchronous>, transform_indices = @transform_2, window_bounds = array<i64: 64, 1>}, {pipeline_mode = #tpu.pipeline_mode<synchronous>, transform_indices = @transform_3, window_bounds = array<i64: 64, 1>}, {pipeline_mode = #tpu.pipeline_mode<synchronous>, transform_indices = @transform_4, window_bounds = array<i64: 1, 1>}, {transform_indices = @transform_5, window_bounds = array<i64: 1, 8>}]} {
    %c0 = arith.constant 0 : index
    %c0_0 = arith.constant 0 : index
    %0 = vector.load %arg2[%c0, %c0_0] : memref<64x32xf32, #tpu.memory_space<vmem>>, vector<64x32xf32>
    %c0_1 = arith.constant 0 : index
    %c0_2 = arith.constant 0 : index
    %1 = vector.load %arg1[%c0_1, %c0_2] : memref<8x32xf32, #tpu.memory_space<vmem>>, vector<8x32xf32>
    %cst = arith.constant dense<0.000000e+00> : vector<64x8xf32>
    %2 = tpu.matmul %0, %1, %cst {dimension_numbers = #tpu.dot_dimension_numbers<[1], [1], [0], [0], [0, 0, 1, 0], [], []>} : vector<64x32xf32>, vector<8x32xf32>, vector<64x8xf32> -> vector<64x8xf32>
    %c0_3 = arith.constant 0 : index
    %c0_4 = arith.constant 0 : index
    %3 = vector.load %arg3[%c0_3, %c0_4] : memref<64x1xf32, #tpu.memory_space<vmem>>, vector<64x1xf32>
    %4 = vector.broadcast %3 : vector<64x1xf32> to vector<64x8xf32>
    %5 = arith.addf %2, %4 : vector<64x8xf32>
    %cst_5 = arith.constant 0.000000e+00 : f32
    %6 = vector.broadcast %cst_5 : f32 to vector<64x8xf32>
    %7 = arith.maximumf %5, %6 : vector<64x8xf32>
    %c0_6 = arith.constant 0 : index
    %c0_7 = arith.constant 0 : index
    %8 = vector.load %arg4[%c0_6, %c0_7] : memref<64x1xf32, #tpu.memory_space<vmem>>, vector<64x1xf32>
    %9 = vector.broadcast %8 : vector<64x1xf32> to vector<64x8xf32>
    %10 = arith.mulf %7, %9 : vector<64x8xf32>
    %cst_8 = arith.constant dense<0.000000e+00> : vector<8xf32>
    %11 = vector.multi_reduction <add>, %10, %cst_8 [0] : vector<64x8xf32> to vector<8xf32>
    %12 = vector.shape_cast %11 : vector<8xf32> to vector<1x8xf32>
    %c0_9 = arith.constant 0 : index
    %c0_10 = arith.constant 0 : index
    %13 = vector.load %arg5[%c0_9, %c0_10] : memref<1x1xf32, #tpu.memory_space<vmem>>, vector<1x1xf32>
    %14 = vector.broadcast %13 : vector<1x1xf32> to vector<1x8xf32>
    %15 = arith.addf %12, %14 : vector<1x8xf32>
    %16 = arith.negf %15 : vector<1x8xf32>
    %17 = math.exp %16 : vector<1x8xf32>
    %cst_11 = arith.constant 1.000000e+00 : f32
    %18 = vector.broadcast %cst_11 : f32 to vector<1x8xf32>
    %19 = arith.addf %18, %17 : vector<1x8xf32>
    %20 = arith.divf %18, %19 : vector<1x8xf32>
    %c0_12 = arith.constant 0 : index
    %c0_13 = arith.constant 0 : index
    %21 = vector.load %arg6[%c0_12, %c0_13] : memref<1x8xf32, #tpu.memory_space<vmem>>, vector<1x8xf32>
    tpu.vector_store %arg6[%c0_12, %c0_13], %20 {strides = array<i32>} : memref<1x8xf32, #tpu.memory_space<vmem>>, vector<1x8xf32>,
    return
  }
  func.func @transform_0(%arg0: i32) -> (i32, i32) {
    %c0_i32 = arith.constant 0 : i32
    %c0_i32_0 = arith.constant 0 : i32
    return %arg0, %c0_i32 : i32, i32
  }
  func.func @transform_1(%arg0: i32) -> (i32, i32) {
    %c0_i32 = arith.constant 0 : i32
    %c0_i32_0 = arith.constant 0 : i32
    %c0_i32_1 = arith.constant 0 : i32
    return %c0_i32, %c0_i32_0 : i32, i32
  }
  func.func @transform_2(%arg0: i32) -> (i32, i32) {
    %c0_i32 = arith.constant 0 : i32
    %c0_i32_0 = arith.constant 0 : i32
    %c0_i32_1 = arith.constant 0 : i32
    return %c0_i32, %c0_i32_0 : i32, i32
  }
  func.func @transform_3(%arg0: i32) -> (i32, i32) {
    %c0_i32 = arith.constant 0 : i32
    %c0_i32_0 = arith.constant 0 : i32
    %c0_i32_1 = arith.constant 0 : i32
    return %c0_i32, %c0_i32_0 : i32, i32
  }
  func.func @transform_4(%arg0: i32) -> (i32, i32) {
    %c0_i32 = arith.constant 0 : i32
    %c0_i32_0 = arith.constant 0 : i32
    %c0_i32_1 = arith.constant 0 : i32
    return %c0_i32, %c0_i32_0 : i32, i32
  }
  func.func @transform_5(%arg0: i32) -> (i32, i32) {
    %c0_i32 = arith.constant 0 : i32
    %c0_i32_0 = arith.constant 0 : i32
    return %c0_i32, %arg0 : i32, i32
  }
}

</mosaic_0001>

<bundles_post_ra>
// kernel: tpu_custom_call.1
= control target key start
LH: loop header
LB: loop body
LE: loop exit
PB: predicated region body
PF: predicated region fallthrough
CT: control target
= control target key end

     0   :  { %s530_s0 = inlined_call_operand.vmem [shape: f32[8,32], index: 0, kind: input, shape index: {}]   ;;  %s531_s1 = inlined_call_operand.vmem [shape: f32[64,32], index: 1, kind: input, shape index: {}]   ;;  %s532_s2 = inlined_call_operand.vmem [shape: f32[64,1], index: 2, kind: input, shape index: {}]   ;;  %s533_s3 = inlined_call_operand.vmem [shape: f32[64,1], index: 3, kind: input, shape index: {}]   ;;  %s534_s4 = inlined_call_operand.<no memory space> [shape: f32[1,1], index: 4, kind: input, shape index: {}]   ;;  %s535_s5 = inlined_call_operand.hbm [shape: f32[1,8], index: 5, kind: output, shape index: {}]  }
   0x1   :  { %v10_v0 = vstv %s534_s4 }
   0x2   :  { %11 = vst [vmem:[#allocation2] sm:$0x1] %v10_v0 }
   0x3   :  { %v31_v1 = vld [vmem:[%s530_s0] sm:$0xff]  ;;  %vm80_vm0 = vcmask 261120   ;;  %v24_v4 = vld [vmem:[%s531_s1 + $0x8] sm:$0xff]  ;;  %v25_v6 = vld [vmem:[%s531_s1 + $0x10] sm:$0xff]  ;;  %v397_v8 = vmov 0  }
   0x4   :  { %v23_v2 = vld [vmem:[%s531_s1] sm:$0xff]  ;;  %351 = vmatprep.subr.msk.mxu0 %vm80_vm0, %v31_v1  ;;  %365 = vmatprep.subr.msk.mxu1 %vm80_vm0, %v31_v1  ;;  %v28_v5 = vld [vmem:[%s531_s1 + $0x28] sm:$0xff]  ;;  %v29_v7 = vld [vmem:[%s531_s1 + $0x30] sm:$0xff] }
   0x5   :  { %v27_v3 = vld [vmem:[%s531_s1 + $0x20] sm:$0xff]  ;;  %352 = vmatpush3.xpose.msk.msra.mxu0 %vm80_vm0, %v31_v1  ;;  %366 = vmatpush3.xpose.msk.msra.mxu1 %vm80_vm0, %v31_v1  ;;  %v34_v10 = vld [vmem:[%s532_s2 + $0x10] sm:$0xff]  ;;  %v26_v11 = vld [vmem:[%s531_s1 + $0x18] sm:$0xff] }
   0x6   :  { %353 = vmatprep.mubr.msk.f32.mxu0 %vm80_vm0, %v23_v2  ;;  %359 = vmatprep.mubr.msk.f32.mxu1 %vm80_vm0, %v27_v3  ;;  %v32_v9 = vld [vmem:[%s532_s2] sm:$0xff]  ;;  %v30_v12 = vld [vmem:[%s531_s1 + $0x38] sm:$0xff]  ;;  %v33_v13 = vld [vmem:[%s532_s2 + $0x8] sm:$0xff] }
   0x7   :  { %369 = vset.pattern.permute.xlu0 %v397_v8  ;;  %370 = vset.pattern.permute.xlu1 %v397_v8  ;;  %v35_v14 = vld [vmem:[%s532_s2 + $0x18] sm:$0xff] }
   0x8   :  { %354 = vmatmul.mubr.msk.f32.vlgmr.msra.gmra.mxu0 %vm80_vm0, %v24_v4  ;;  %360 = vmatmul.mubr.msk.f32.vlgmr.msra.gmra.mxu1 %vm80_vm0, %v28_v5 }
   0x9   :  { %356 = vmatprep.mubr.msk.f32.mxu0 %vm80_vm0, %v25_v6  ;;  %362 = vmatprep.mubr.msk.f32.mxu1 %vm80_vm0, %v29_v7 }
   0xa   :  { %42 = vperm.xlu0 %369, %v32_v9   ;;  %52 = vperm.xlu1 %370, %v34_v10  }
   0xb   :  { %12 = vsyncpa [#allocation4], 0  ;;  %v221_v15 = vld [vmem:[%s533_s3] sm:$0xff]  ;;  %v222_v16 = vld [vmem:[%s533_s3 + $0x8] sm:$0xff]  ;;  %vm277_vm1 = vcmask 64512   ;;  %vm316_vm2 = vcmask 57344  }
   0xc   :  { %357 = vmatmul.mubr.msk.f32.gmra.mxu0 %vm80_vm0, %v26_v11  ;;  %363 = vmatmul.mubr.msk.f32.gmra.mxu1 %vm80_vm0, %v30_v12  ;;  %v36_v17 = vld [vmem:[%s532_s2 + $0x20] sm:$0xff]  ;;  %v223_v18 = vld [vmem:[%s533_s3 + $0x10] sm:$0xff]  ;;  %v37_v19 = vld [vmem:[%s532_s2 + $0x28] sm:$0xff] }
   0xd   :  { %v224_v20 = vld [vmem:[%s533_s3 + $0x18] sm:$0xff]  ;;  %v38_v21 = vld [vmem:[%s532_s2 + $0x30] sm:$0xff]  ;;  %v225_v22 = vld [vmem:[%s533_s3 + $0x20] sm:$0xff] }
   0xe   :  { %47 = vperm.xlu0 %369, %v33_v13   ;;  %57 = vperm.xlu1 %370, %v35_v14   ;;  %v39_v23 = vld [vmem:[%s532_s2 + $0x38] sm:$0xff]  ;;  %v226_v24 = vld [vmem:[%s533_s3 + $0x28] sm:$0xff]  ;;  %v227_v25 = vld [vmem:[%s533_s3 + $0x30] sm:$0xff]  ;;  %s398_s2 = smov [#allocation3]  }
   0xf   :  { %v228_v26 = vld [vmem:[%s533_s3 + $0x38] sm:$0xff]  ;;  %v299_v27 = vld [vmem:[#allocation2] sm:$0x1]  ;;  %s324_s3 = sshll.u32 %s398_s2, 4  ;;  %s325_s3 = int_to_ptr.vmem [resolvable:$true] %s324_s3 }
  0x10   :  { %s375_s15 = scalar_lea.vmem %s325_s3, 16  ;;  %s379_s16 = scalar_lea.vmem %s325_s3, 32 }
  0x11   :  { %p376_p0 = scmp.ne.s32.totalorder %s325_s3, %s375_s15  ;;  %p380_p1 = scmp.lt.s32.totalorder %s325_s3, %s325_s3 }
  0x12   :  { %231 = vperm.xlu0 %369, %v221_v15   ;;  %236 = vperm.xlu1 %370, %v222_v16   ;;  %p381_p2 = scmp.lt.s32.totalorder %s379_s16, %s375_s15 }
  0x14   :  { %p382_p3 = por %p381_p2, %p380_p1 }
  0x16   :  { %62 = vperm.xlu0 %369, %v36_v17   ;;  %241 = vperm.xlu1 %370, %v223_v18   ;;  %p383_p4 = pnand %p382_p3, %p376_p0 }
  0x1a   :  { %67 = vperm.xlu0 %369, %v37_v19   ;;  %246 = vperm.xlu1 %370, %v224_v20  }
  0x1e   :  { %72 = vperm.xlu0 %369, %v38_v21   ;;  %251 = vperm.xlu1 %370, %v225_v22  }
  0x22   :  { %77 = vperm.xlu0 %369, %v39_v23   ;;  %256 = vperm.xlu1 %370, %v226_v24  }
  0x26   :  { %261 = vperm.xlu0 %369, %v227_v25   ;;  %266 = vperm.xlu1 %370, %v228_v26   ;;  %v305_v26 = vlaneseq }
  0x2a   :  { %302 = vperm.xlu0 %369, %v299_v27  }
  0x85   :  { %v43_v28 = vpop.permute.xlu0 %42  ;;  %v53_v29 = vpop.permute.xlu1 %52 }
  0x89   :  { %v48_v30 = vpop.permute.xlu0 %47  ;;  %v58_v31 = vpop.permute.xlu1 %57 }
  0x8d   :  { %v232_v32 = vpop.permute.xlu0 %231  ;;  %v237_v33 = vpop.permute.xlu1 %236 }
  0x91   :  { %v63_v34 = vpop.permute.xlu0 %62  ;;  %v242_v35 = vpop.permute.xlu1 %241 }
  0x95   :  { %v68_v36 = vpop.permute.xlu0 %67  ;;  %v247_v39 = vpop.permute.xlu1 %246 }
  0x99   :  { %v73_v47 = vpop.permute.xlu0 %72  ;;  %v252_v52 = vpop.permute.xlu1 %251 }
  0x9d   :  { %v78_v63 = vpop.permute.xlu0 %77  ;;  %v257_v5 = vpop.permute.xlu1 %256 }
  0xa1   :  { %v262_v14 = vpop.permute.xlu0 %261  ;;  %v267_v18 = vpop.permute.xlu1 %266 }
  0xc8   :  { %v355_v37 = vpop.f32.mrf.mxu0  ;;  %v361_v38 = vpop.f32.mrf.mxu1 }
  0xc9   :  { %v180_v40 = vadd.f32 %v355_v37, %v48_v30  ;;  %v200_v53 = vadd.f32 %v361_v38, %v68_v36 }
  0xca   :  { %v174_v41 = vpop.f32.mrf.mxu0  ;;  %v194_v42 = vpop.f32.mrf.mxu1 }
  0xcb   :  { %v175_v43 = vadd.f32 %v174_v41, %v43_v28  ;;  %v214_v44 = vmax.f32 %v180_v40, 0.0  ;;  %v195_v49 = vadd.f32 %v194_v42, %v63_v34  ;;  %v218_v0 = vmax.f32 %v200_v53, 0.0  ;;  %v303_v34 = vpop.permute.xlu0 %302 }
  0xcc   :  { %v358_v45 = vpop.f32.mrf.mxu0  ;;  %v364_v46 = vpop.f32.mrf.mxu1 }
  0xcd   :  { %v213_v48 = vmax.f32 %v175_v43, 0.0  ;;  %v190_v50 = vadd.f32 %v358_v45, %v58_v31  ;;  %v270_v56 = vmul.f32 %v237_v33, %v214_v44  ;;  %v217_v60 = vmax.f32 %v195_v49, 0.0 }
  0xce   :  { %v184_v51 = vpop.f32.mrf.mxu0  ;;  %v204_v55 = vpop.f32.mrf.mxu1  ;;  %v210_v3 = vadd.f32 %v364_v46, %v78_v63  ;;  %v274_v11 = vmul.f32 %v257_v5, %v218_v0 }
  0xcf   :  { %v269_v54 = vmul.f32 %v232_v32, %v213_v48  ;;  %v216_v57 = vmax.f32 %v190_v50, 0.0  ;;  %v185_v58 = vadd.f32 %v184_v51, %v53_v29  ;;  %v205_v62 = vadd.f32 %v204_v55, %v73_v47 }
  0xd0   :  { %v279_v1 = vsel %vm277_vm1, %v270_v56, 0.0  ;;  %v273_v7 = vmul.f32 %v252_v52, %v217_v60  ;;  %v220_v13 = vmax.f32 %v210_v3, 0.0  ;;  %v287_v20 = vsel %vm277_vm1, %v274_v11, 0.0 }
  0xd1   :  { %v278_v59 = vsel %vm277_vm1, %v269_v54, 0.0  ;;  %v215_v61 = vmax.f32 %v185_v58, 0.0  ;;  %v272_v2 = vmul.f32 %v247_v39, %v216_v57  ;;  %v219_v9 = vmax.f32 %v205_v62, 0.0 }
  0xd2   :  { %v280_v6 = vadd.f32 %v279_v1, %v278_v59  ;;  %v285_v16 = vsel %vm277_vm1, %v273_v7, 0.0  ;;  %v276_v21 = vmul.f32 %v267_v18, %v220_v13  ;;  %v306_v29 = vshrl.u32 %v305_v26, 7 }
  0xd3   :  { %v271_v4 = vmul.f32 %v242_v35, %v215_v61  ;;  %v283_v12 = vsel %vm277_vm1, %v272_v2, 0.0  ;;  %v275_v17 = vmul.f32 %v262_v14, %v219_v9 }
  0xd4   :  { %v291_v25 = vsel %vm277_vm1, %v276_v21, 0.0  ;;  %v307_v32 = vsub.s32 0, %v306_v29 }
  0xd5   :  { %v281_v8 = vsel %vm277_vm1, %v271_v4, 0.0  ;;  %v289_v23 = vsel %vm277_vm1, %v275_v17, 0.0 }
  0xd6   :  { %v282_v10 = vadd.f32 %v281_v8, %v280_v6  ;;  %v308_v36 = vrot.slane %v303_v34, %v307_v32 }
  0xd8   :  { %v284_v15 = vadd.f32 %v283_v12, %v282_v10 }
  0xda   :  { %v286_v19 = vadd.f32 %v285_v16, %v284_v15 }
  0xdc   :  { %v288_v22 = vadd.f32 %v287_v20, %v286_v19 }
  0xde   :  { %v290_v24 = vadd.f32 %v289_v23, %v288_v22 }
  0xe0   :  { %v292_v27 = vadd.f32 %v291_v25, %v290_v24 }
  0xe2   :  { %v293_v28 = vrot.slane %v292_v27, 4 }
  0xe4   :  { %v294_v30 = vadd.f32 %v293_v28, %v292_v27 }
  0xe6   :  { %v295_v31 = vrot.slane %v294_v30, 2 }
  0xe8   :  { %v296_v33 = vadd.f32 %v295_v31, %v294_v30 }
  0xea   :  { %v297_v35 = vrot.slane %v296_v33, 1 }
  0xec   :  { %v298_v37 = vadd.f32 %v297_v35, %v296_v33 }
  0xee   :  { %v309_v38 = vadd.f32 %v308_v36, %v298_v37 }
  0xf0   :  { %v341_v39 = vmul.f32 -1.442695, %v309_v38 }
  0xf2   :  { %371 = vpow2.f32 %v341_v39 }
  0xff   :  { %v372_v40 = vpop.eup %371 }
 0x100   :  { %v313_v41 = vadd.f32 1.0, %v372_v40 }
 0x102   :  { %373 = vrcp.f32 %v313_v41 }
 0x10f   :  { %v374_v42 = vpop.eup %373 }
 0x110   :  { %317 = vst.msk [vmem:[#allocation3] sm:$0x1] %vm316_vm2, %v374_v42 }
 0x111   :  { %386 = shalt.err (!%p383_p4)
}
 0x112   :  { %327 = dma.vmem_to_hbm [thread:$0]  %s325_s3, 16, %s535_s5, [#allocation4]  }
 0x113   :  { %395 = dma.done.wait [#allocation4], 16  }
 0x114   :  { %396 = vsyncadd [#allocation4], 4294967280 }
 0x115   :  { %331 = vsyncpa [#allocation4], 1 }

</bundles_post_ra>
